<compile_context>
chip_gen: v7x
topology: tpu7x:2x2x1
jax: 0.10.0
libtpu: 0.0.40
codegen_flags: <defaults>
</compile_context>

<pallas_src>
import functools

import jax
import jax.numpy as jnp
from jax.experimental import pallas as pl
from jax.experimental.pallas import tpu as pltpu


def _neg_log_sigmoid(x):
    # -log(sigmoid(x)) = max(-x, 0) + log1p(exp(-|x|)) (numerically stable)
    return jnp.maximum(-x, 0.0) + jnp.log1p(jnp.exp(-jnp.abs(x)))


def _pv_loss_kernel(emb_e_ref, emb_v_pos_ref, emb_v_neg_ref, out_ref, *,
                    valid_bsz, mask_batch):
    """One grid step processes TB batch rows and emits one partial sum.

    emb_e_ref     : (TB, 1, d)   bf16 paragraph embeddings
    emb_v_pos_ref : (TB, Lp, d)  bf16 positive-term embeddings
    emb_v_neg_ref : (TB, Ln, d)  bf16 negative-term embeddings
    out_ref       : (1, 8, 128)  f32 partial-sum slab (value splatted; the
                                 wrapper reads element [0, 0] of each block).
    """
    e = emb_e_ref[...]                                   # (TB, 1, d) bf16
    vp = emb_v_pos_ref[...]                              # (TB, Lp, d) bf16
    vn = emb_v_neg_ref[...]                              # (TB, Ln, d) bf16

    # MXU batched contraction over d (bf16 in, f32 accumulate).
    dims = (((2,), (2,)), ((0,), (0,)))                  # contract d, batch b
    dot_p = jax.lax.dot_general(e, vp, dims,
                                preferred_element_type=jnp.float32)  # (TB,1,Lp)
    dot_n = jax.lax.dot_general(e, vn, dims,
                                preferred_element_type=jnp.float32)  # (TB,1,Ln)

    neg_p = _neg_log_sigmoid(dot_p)                      # pos terms
    neg_n = _neg_log_sigmoid(-dot_n)                     # sign applied to dot

    if mask_batch:
        # zero contributions from batch-padding rows (bsz % TB != 0)
        base = pl.program_id(0) * neg_p.shape[0]
        bp = base + jax.lax.broadcasted_iota(jnp.int32, neg_p.shape, 0)
        bn = base + jax.lax.broadcasted_iota(jnp.int32, neg_n.shape, 0)
        neg_p = jnp.where(bp < valid_bsz, neg_p, 0.0)
        neg_n = jnp.where(bn < valid_bsz, neg_n, 0.0)

    # VALU accumulation across batch rows; only the small (1, L) remainder goes
    # through the cross-lane reduce.
    part_p = jnp.sum(neg_p, axis=0)                      # (1, Lp)
    part_n = jnp.sum(neg_n, axis=0)                      # (1, Ln)
    total = jnp.sum(part_p) + jnp.sum(part_n)            # scalar f32

    # lane-dense (8,128) output block; splat the partial, wrapper picks [0,0]
    out_ref[...] = jnp.broadcast_to(total, out_ref.shape)


def _round_up(x, m):
    return -(-x // m) * m


def _choose_batch_tile(bsz, l_pos, l_neg, d, itemsize, budget_bytes=26 << 20):
    """Pick TB (batch rows per grid step) from a VMEM budget.

    Accounts for (16,128)/(8,128) tile padding of the double-buffered bf16
    input blocks plus the f32 (TB, 1, L) dot / loss intermediates.
    """
    d_pad = _round_up(d, 128)                       # lanes pad to 128
    sub = 16 if itemsize == 2 else 8                # bf16 tiles pack 16 sublanes
    v_row = (_round_up(l_pos, sub) + _round_up(l_neg, sub)) * d_pad * itemsize
    e_row = sub * d_pad * itemsize                  # (1, d) row pads to one tile
    f32_row = 3 * 8 * (_round_up(l_pos, 128) + _round_up(l_neg, 128)) * 4
    per_row = 2 * (v_row + e_row) + f32_row         # x2: double-buffered inputs
    tb = int(max(1, min(bsz, budget_bytes // per_row)))
    if bsz >= 2:
        # keep at least 2 grid blocks so both v7x TensorCores get work
        tb = min(tb, pl.cdiv(bsz, 2))
    nb = pl.cdiv(bsz, tb)
    if nb > 1 and nb % 2 == 1:                      # prefer an even block count
        tb = pl.cdiv(bsz, nb + 1)
    return int(max(1, tb))


def paragraph_vector_neg_loss_sum(emb_e, emb_v_pos, emb_v_neg):
    """sum_b [ sum_l -log_sig(<e_b, vpos_bl>) + sum_l -log_sig(-<e_b, vneg_bl>) ]."""
    bsz, l_pos, d = emb_v_pos.shape
    _, l_neg, _ = emb_v_neg.shape
    emb_e3 = emb_e.reshape(bsz, 1, d)

    itemsize = emb_v_pos.dtype.itemsize
    tb = _choose_batch_tile(bsz, l_pos, l_neg, d, itemsize)
    num_blocks = pl.cdiv(bsz, tb)
    padded_bsz = num_blocks * tb
    mask_batch = padded_bsz != bsz
    if mask_batch:
        pad = padded_bsz - bsz
        emb_e3 = jnp.pad(emb_e3, ((0, pad), (0, 0), (0, 0)))
        emb_v_pos = jnp.pad(emb_v_pos, ((0, pad), (0, 0), (0, 0)))
        emb_v_neg = jnp.pad(emb_v_neg, ((0, pad), (0, 0), (0, 0)))

    kernel = functools.partial(
        _pv_loss_kernel, valid_bsz=bsz, mask_batch=mask_batch)

    l_tot = l_pos + l_neg
    cost = pl.CostEstimate(
        flops=2 * padded_bsz * l_tot * d + 8 * padded_bsz * l_tot,
        transcendentals=2 * padded_bsz * l_tot,
        bytes_accessed=(padded_bsz * (l_tot + 1) * d * itemsize
                        + num_blocks * 8 * 128 * 4),
    )

    out = pl.pallas_call(
        kernel,
        out_shape=jax.ShapeDtypeStruct((num_blocks, 8, 128), jnp.float32),
        grid_spec=pltpu.PrefetchScalarGridSpec(
            num_scalar_prefetch=0,
            grid=(num_blocks,),
            in_specs=[
                pl.BlockSpec((tb, 1, d), lambda i: (i, 0, 0)),
                pl.BlockSpec((tb, l_pos, d), lambda i: (i, 0, 0)),
                pl.BlockSpec((tb, l_neg, d), lambda i: (i, 0, 0)),
            ],
            out_specs=pl.BlockSpec((1, 8, 128), lambda i: (i, 0, 0)),
        ),
        compiler_params=pltpu.CompilerParams(
            dimension_semantics=("parallel",),
            vmem_limit_bytes=40 << 20),
        cost_estimate=cost,
    )(emb_e3, emb_v_pos, emb_v_neg)
    return jnp.sum(out[:, 0, 0])


def paragraph_vector_loss(emb_e, token_pos, emb_table, distribution,
                          *, n_neg=5, max_len=256, rng_key=None,
                          compute_dtype=jnp.bfloat16):
    """JAX/Pallas equivalent of ParagraphVectorLoss.forward."""
    if rng_key is None:
        rng_key = jax.random.PRNGKey(42)

    bsz, pad_len = token_pos.shape
    if pad_len > max_len:
        pad_len = max_len
        token_pos = token_pos[:, :pad_len]

    lens = (token_pos != 0).sum(axis=1)
    n_token = (n_neg + 1) * lens.sum()

    # negative sampling with replacement according to `distribution`
    # (equivalent of neg_sampling(..., subtract=False, replace=True))
    logits = jnp.log(distribution)
    token_neg = jax.random.categorical(
        rng_key, logits, shape=(bsz, pad_len * n_neg)).astype(token_pos.dtype)

    # bf16 materialization halves HBM traffic for the bandwidth-bound reads;
    # the kernel's MXU contraction accumulates in f32.
    emb_table_c = emb_table.astype(compute_dtype)
    emb_e_c = emb_e.astype(compute_dtype)

    # TODO(synk): fuse the embedding gather into the kernel (scalar-prefetch the
    # token ids + per-row DMA gather from an HBM-resident emb_table) to drop the
    # HBM write + re-read of emb_v_pos / emb_v_neg.
    emb_v_pos = jnp.take(emb_table_c, token_pos, axis=0)   # (bsz, pad_len, d)
    emb_v_neg = jnp.take(emb_table_c, token_neg, axis=0)   # (bsz, pad_len*n_neg, d)

    loss_sum = paragraph_vector_neg_loss_sum(emb_e_c, emb_v_pos, emb_v_neg)
    return loss_sum / n_token.astype(jnp.float32)


def _reference_loss(emb_e, emb_v, n_token):
    dot = jnp.sum(emb_e[:, None, :].astype(jnp.float32)
                  * emb_v.astype(jnp.float32), axis=-1)
    return -jnp.sum(jax.nn.log_sigmoid(dot)) / n_token.astype(jnp.float32)


if __name__ == "__main__":
    # small, deterministic synthetic setup
    n_v = 64        # vocab size
    d = 32          # hidden dim
    n_neg = 5
    bsz = 2
    pad_len = 8
    max_len = 256

    key = jax.random.PRNGKey(0)
    k_emb, k_e, k_tok, k_neg = jax.random.split(key, 4)

    # deterministic "parameters" (nn.Embedding weight + sampling distribution)
    emb_table = 0.1 * jax.random.normal(k_emb, (n_v, d), dtype=jnp.float32)
    distribution = jnp.arange(1, n_v + 1, dtype=jnp.float32) ** 0.75
    distribution = distribution / distribution.sum()

    # inputs
    emb_e = jax.random.normal(k_e, (bsz, d), dtype=jnp.float32)
    token_pos = jax.random.randint(k_tok, (bsz, pad_len), 0, n_v,
                                   dtype=jnp.int32)
    token_pos = token_pos.at[0, 6:].set(0)   # some padding in row 0

    loss = paragraph_vector_loss(emb_e, token_pos, emb_table, distribution,
                                 n_neg=n_neg, max_len=max_len, rng_key=k_neg)
    loss = jax.block_until_ready(loss)

    # correctness check against pure-JAX references (same neg samples)
    lens = (token_pos != 0).sum(axis=1)
    n_token = (n_neg + 1) * lens.sum()
    token_neg = jax.random.categorical(
        k_neg, jnp.log(distribution),
        shape=(bsz, pad_len * n_neg)).astype(token_pos.dtype)

    # (a) exact-math reference: same bf16 materialization as the kernel path
    emb_table_bf = emb_table.astype(jnp.bfloat16)
    emb_e_bf = emb_e.astype(jnp.bfloat16)
    emb_v_bf = jnp.concatenate(
        (jnp.take(emb_table_bf, token_pos, axis=0),
         -jnp.take(emb_table_bf, token_neg, axis=0)), axis=1)
    ref_bf = _reference_loss(emb_e_bf, emb_v_bf, n_token)
    assert jnp.allclose(loss, ref_bf, rtol=1e-5, atol=1e-5), (loss, ref_bf)

    # (b) sanity check vs full-f32 reference (loose tolerance: bf16 inputs)
    emb_v_f32 = jnp.concatenate(
        (jnp.take(emb_table, token_pos, axis=0),
         -jnp.take(emb_table, token_neg, axis=0)), axis=1)
    ref_f32 = _reference_loss(emb_e, emb_v_f32, n_token)
    assert jnp.allclose(loss, ref_f32, rtol=5e-2, atol=5e-2), (loss, ref_f32)

    print("KERNEL_OK")
</pallas_src>

<mosaic_0001>
module attributes {stable_mosaic.version = 11 : i64} {
  func.func @_pv_loss_kernel(%arg0: i32, %arg1: memref<1x1x32xbf16, #tpu.memory_space<vmem>>, %arg2: memref<1x8x32xbf16, #tpu.memory_space<vmem>>, %arg3: memref<1x40x32xbf16, #tpu.memory_space<vmem>>, %arg4: memref<1x8x128xf32, #tpu.memory_space<vmem>>) attributes {dimension_semantics = [#tpu.dimension_semantics<parallel>], iteration_bounds = array<i64: 2>, scalar_prefetch = 0 : i64, scratch_operands = 0 : i64, tpu.core_type = #tpu.core_type<tc>, window_params = [{transform_indices = @transform_0, window_bounds = array<i64: 1, 1, 32>}, {transform_indices = @transform_1, window_bounds = array<i64: 1, 8, 32>}, {transform_indices = @transform_2, window_bounds = array<i64: 1, 40, 32>}, {transform_indices = @transform_3, window_bounds = array<i64: 1, 8, 128>}]} {
    %c0 = arith.constant 0 : index
    %c0_0 = arith.constant 0 : index
    %c0_1 = arith.constant 0 : index
    %0 = vector.load %arg1[%c0, %c0_0, %c0_1] : memref<1x1x32xbf16, #tpu.memory_space<vmem>>, vector<1x1x32xbf16>
    %c0_2 = arith.constant 0 : index
    %c0_3 = arith.constant 0 : index
    %c0_4 = arith.constant 0 : index
    %1 = vector.load %arg2[%c0_2, %c0_3, %c0_4] : memref<1x8x32xbf16, #tpu.memory_space<vmem>>, vector<1x8x32xbf16>
    %c0_5 = arith.constant 0 : index
    %c0_6 = arith.constant 0 : index
    %c0_7 = arith.constant 0 : index
    %2 = vector.load %arg3[%c0_5, %c0_6, %c0_7] : memref<1x40x32xbf16, #tpu.memory_space<vmem>>, vector<1x40x32xbf16>
    %cst = arith.constant dense<0.000000e+00> : vector<1x1x8xf32>
    %3 = tpu.matmul %0, %1, %cst {dimension_numbers = #tpu.dot_dimension_numbers<[2], [2], [1], [1], [0, 0, 0, 1, 1, 1], [0], [0]>} : vector<1x1x32xbf16>, vector<1x8x32xbf16>, vector<1x1x8xf32> -> vector<1x1x8xf32>
    %cst_8 = arith.constant dense<0.000000e+00> : vector<1x1x40xf32>
    %4 = tpu.matmul %0, %2, %cst_8 {dimension_numbers = #tpu.dot_dimension_numbers<[2], [2], [1], [1], [0, 0, 0, 1, 1, 1], [0], [0]>} : vector<1x1x32xbf16>, vector<1x40x32xbf16>, vector<1x1x40xf32> -> vector<1x1x40xf32>
    %cst_9 = arith.constant 0.000000e+00 : f32
    %5 = vector.broadcast %cst_9 : f32 to vector<1x1x8xf32>
    %6 = arith.subf %5, %3 : vector<1x1x8xf32>
    %cst_10 = arith.constant 0.000000e+00 : f32
    %7 = vector.broadcast %cst_10 : f32 to vector<1x1x8xf32>
    %8 = arith.maximumf %6, %7 : vector<1x1x8xf32>
    %9 = math.absf %3 : vector<1x1x8xf32>
    %cst_11 = arith.constant 0.000000e+00 : f32
    %10 = vector.broadcast %cst_11 : f32 to vector<1x1x8xf32>
    %11 = arith.subf %10, %9 : vector<1x1x8xf32>
    %12 = math.exp %11 : vector<1x1x8xf32>
    %13 = math.log1p %12 : vector<1x1x8xf32>
    %14 = arith.addf %8, %13 : vector<1x1x8xf32>
    %cst_12 = arith.constant 0.000000e+00 : f32
    %15 = vector.broadcast %cst_12 : f32 to vector<1x1x40xf32>
    %16 = arith.subf %15, %4 : vector<1x1x40xf32>
    %cst_13 = arith.constant 0.000000e+00 : f32
    %17 = vector.broadcast %cst_13 : f32 to vector<1x1x40xf32>
    %18 = arith.subf %17, %16 : vector<1x1x40xf32>
    %cst_14 = arith.constant 0.000000e+00 : f32
    %19 = vector.broadcast %cst_14 : f32 to vector<1x1x40xf32>
    %20 = arith.maximumf %18, %19 : vector<1x1x40xf32>
    %21 = math.absf %16 : vector<1x1x40xf32>
    %cst_15 = arith.constant 0.000000e+00 : f32
    %22 = vector.broadcast %cst_15 : f32 to vector<1x1x40xf32>
    %23 = arith.subf %22, %21 : vector<1x1x40xf32>
    %24 = math.exp %23 : vector<1x1x40xf32>
    %25 = math.log1p %24 : vector<1x1x40xf32>
    %26 = arith.addf %20, %25 : vector<1x1x40xf32>
    %cst_16 = arith.constant dense<0.000000e+00> : vector<1x8xf32>
    %27 = vector.multi_reduction <add>, %14, %cst_16 [0] : vector<1x1x8xf32> to vector<1x8xf32>
    %cst_17 = arith.constant dense<0.000000e+00> : vector<1x40xf32>
    %28 = vector.multi_reduction <add>, %26, %cst_17 [0] : vector<1x1x40xf32> to vector<1x40xf32>
    %29 = vector.shape_cast %27 : vector<1x8xf32> to vector<1x1x8xf32>
    %cst_18 = arith.constant dense<0.000000e+00> : vector<1xf32>
    %30 = vector.multi_reduction <add>, %29, %cst_18 [1, 2] : vector<1x1x8xf32> to vector<1xf32>
    %31 = vector.shape_cast %30 : vector<1xf32> to vector<1x1x1xf32>
    %32 = vector.extract %31[0, 0, 0] : f32 from vector<1x1x1xf32>
    %33 = vector.shape_cast %28 : vector<1x40xf32> to vector<1x1x40xf32>
    %cst_19 = arith.constant dense<0.000000e+00> : vector<1xf32>
    %34 = vector.multi_reduction <add>, %33, %cst_19 [1, 2] : vector<1x1x40xf32> to vector<1xf32>
    %35 = vector.shape_cast %34 : vector<1xf32> to vector<1x1x1xf32>
    %36 = vector.extract %35[0, 0, 0] : f32 from vector<1x1x1xf32>
    %37 = arith.addf %32, %36 : f32
    %38 = vector.broadcast %37 : f32 to vector<1x8x128xf32>
    %c0_20 = arith.constant 0 : index
    %c0_21 = arith.constant 0 : index
    %c0_22 = arith.constant 0 : index
    %39 = vector.load %arg4[%c0_20, %c0_21, %c0_22] : memref<1x8x128xf32, #tpu.memory_space<vmem>>, vector<1x8x128xf32>
    tpu.vector_store %arg4[%c0_20, %c0_21, %c0_22], %38 {strides = array<i32>} : memref<1x8x128xf32, #tpu.memory_space<vmem>>, vector<1x8x128xf32>,
    return
  }
  func.func @transform_0(%arg0: i32) -> (i32, i32, i32) {
    %c0_i32 = arith.constant 0 : i32
    %c0_i32_0 = arith.constant 0 : i32
    %c0_i32_1 = arith.constant 0 : i32
    return %arg0, %c0_i32, %c0_i32_0 : i32, i32, i32
  }
  func.func @transform_1(%arg0: i32) -> (i32, i32, i32) {
    %c0_i32 = arith.constant 0 : i32
    %c0_i32_0 = arith.constant 0 : i32
    %c0_i32_1 = arith.constant 0 : i32
    return %arg0, %c0_i32, %c0_i32_0 : i32, i32, i32
  }
  func.func @transform_2(%arg0: i32) -> (i32, i32, i32) {
    %c0_i32 = arith.constant 0 : i32
    %c0_i32_0 = arith.constant 0 : i32
    %c0_i32_1 = arith.constant 0 : i32
    return %arg0, %c0_i32, %c0_i32_0 : i32, i32, i32
  }
  func.func @transform_3(%arg0: i32) -> (i32, i32, i32) {
    %c0_i32 = arith.constant 0 : i32
    %c0_i32_0 = arith.constant 0 : i32
    %c0_i32_1 = arith.constant 0 : i32
    return %arg0, %c0_i32, %c0_i32_0 : i32, i32, i32
  }
}

</mosaic_0001>

<bundles_post_ra>
// kernel: tpu_custom_call.1
= control target key start
LH: loop header
LB: loop body
LE: loop exit
PB: predicated region body
PF: predicated region fallthrough
CT: control target
= control target key end

     0   :  { %8 = vsyncpa [#allocation3], 0  ;;  %s765_s0 = inlined_call_operand.vmem [shape: bf16[2,1,32], index: 0, kind: input, shape index: {}]   ;;  %s766_s1 = inlined_call_operand.vmem [shape: bf16[2,8,32], index: 1, kind: input, shape index: {}]   ;;  %s767_s2 = inlined_call_operand.vmem [shape: bf16[2,40,32], index: 2, kind: input, shape index: {}]   ;;  %s768_s3 = inlined_call_operand.hbm [shape: f32[2,8,128], index: 3, kind: output, shape index: {}]  }
   0x1   :  { %10 = vsyncpa [#allocation3 + $0x1], 0  ;;  %s653_s12 = smov 0   ;;  %s655_s13 = smov 0  }
   0x2   :  { %s657_s14 = smov 0   ;;  %s659_s15 = smov 0  }
   0x3 LB: > { %s674_s16 = sadd.s32 4294967295, %s628_s15   ;;  %s471_s17 = sadd.s32 4294967294, %s628_s15   ;;  %s628_s15 = sphi %s659_s15, %s774_s15   ;;  %s624_s14 = sphi %s657_s14, %s773_s14   ;;  %s620_s13 = sphi %s655_s13, %s772_s13   ;;  %s616_s12 = sphi %s653_s12, %s771_s12  }
   0x4   : > { %s678_s18 = sadd.s32 1, %s628_s15   ;;  %s101_s19 = sadd.s32 1, %s624_s14 }
   0x5   : > { %s98_s20 = ssub.s32 %s628_s15, %s678_s18  ;;  %p111_p0 = scmp.ne.s32.totalorder %s624_s14, %s620_s13 }
   0x6   : > { %p99_p1 = scmp.eq.s32.totalorder %s98_s20, 0  ;;  %p112_p2 = scmp.eq.s32.totalorder %s674_s16, 1 }
   0x7   : > { %p117_p3 = scmp.ne.s32.totalorder %s620_s13, %s616_s12  ;;  %p118_p4 = scmp.eq.s32.totalorder %s471_s17, 1 }
   0x8   : > { %s689_s21 = scalar_select %p99_p1, %s624_s14, %s101_s19  }
   0x9   : > { %p691_p5 = por %p112_p2, %p111_p0  ;;  %p695_p6 = por %p118_p4, %p117_p3 }
   0xa   : > { %p474_p7 = scmp.ge.s32.totalorder %s628_s15, 1  ;;  %p157_p8 = scmp.lt.s32.totalorder %s628_s15, 3 }
   0xc   : > { %p158_p9 = pnand %p474_p7, %p157_p8 }
   0xd   : > { %p188_p10 = scmp.lt.s32.totalorder (!%p158_p9), %s674_s16, 1  ;;  %v630_v0 = vmov (!%p158_p9), 0.0   ;;  %vm631_vm0 = vmmov (!%p158_p9), 0   ;;  %vm208_vm1 = vcmask (!%p158_p9), 261120   ;;  %vm352_vm3 = vcmask (!%p158_p9), 57344   ;;  %s185_s9 = sand.u32 (!%p158_p9), 1, %s620_s13  }
   0xe   : > { %161 = sbr.rel (%p158_p9) target bundleno = 522 (0x20a), region = 32  ;;  %493 = vmatprep.subr.bf16.mxu0 (!%p158_p9), %v630_v0  ;;  %499 = vmatprep.subr.bf16.mxu1 (!%p158_p9), %v630_v0  ;;  %vm363_vm5 = vcmask (!%p158_p9), 319488   ;;  %s475_s10 = sshll.u32 (!%p158_p9), %s185_s9, 3 }
   0xf   : > { %495 = vmatprep.mubr.msk.bf16.mxu0 (!%p158_p9), %vm631_vm0, %v630_v0  ;;  %505 = vmatprep.mubr.msk.bf16.mxu1 (!%p158_p9), %vm631_vm0, %v630_v0  ;;  %s484_s11 = sshll.u32 (!%p158_p9), %s674_s16, 7  ;;  %s187_s19 = scalar_lea.vmem (!%p158_p9), [#allocation2], %s475_s10 }
  0x10   : > { %s391_s20 = sshll.u32 (!%p158_p9), %s187_s19, 4  ;;  %s723_s28 = scalar_lea.hbm (!%p158_p9), %s768_s3, %s484_s11  ;;  %s725_s20 = int_to_ptr.vmem [resolvable:$true] %s391_s20 }
  0x11   : > { %s566_s30 = scalar_lea.vmem (!%p158_p9), %s725_s20, 128 }
  0x12   : > { %p567_p11 = scmp.ne.s32.totalorder (!%p158_p9), %s725_s20, %s566_s30 }
  0x14   : > { %p568_p12 = pnand (!%p158_p9), %p567_p11, %p691_p5 }
  0x15   : > { %s189_s24 = scalar_select %p188_p10, %s674_s16, 1 }
  0x16   : > { %p569_p13 = pneg %p568_p12  ;;  %s632_s16 = smov [#allocation2]  }
  0x17   : > { %s476_s25 = sshll.u32 %s189_s24, 2  ;;  %s509_s26 = smul.u32 20, %s189_s24 }
  0x18   : > { %s194_s29 = scalar_lea.vmem %s766_s1, %s476_s25  ;;  %s190_s8 = scalar_lea.vmem %s765_s0, %s189_s24 }
  0x19   : > { %v202_v1 = vld [vmem:[%s194_s29] sm:$0xf]  ;;  %s199_s5 = scalar_lea.vmem %s767_s2, %s509_s26  ;;  %s378_s29 = scalar_lea.sflag [#allocation3], %s185_s9 }
  0x1a   : > { %v213_v2 = vsel %vm208_vm1, %v202_v1, 0  ;;  %v555_v3 = vld [vmem:[%s199_s5] sm:$0xff]   ;;  %v556_v5 = vld [vmem:[%s199_s5 + $0x8] sm:$0xff]   ;;  %v557_v8 = vld [vmem:[%s199_s5 + $0x10] ss:$0 sps:$4 sm:$0xff]   ;;  %s570_s4 = sshll.u32 %s632_s16, 4  ;;  %s571_s4 = int_to_ptr.vmem [resolvable:$false] %s570_s4 }
  0x1b   : > { %494 = vmatpush3.bf16.xpose.msra.mxu0 %v213_v2  ;;  %v269_v4 = vsel %vm208_vm1, %v555_v3, 0  ;;  %v201_v6 = vld [vmem:[%s190_s8] sm:$0x1]  ;;  %v272_v7 = vsel %vm208_vm1, %v556_v5, 0  ;;  %v275_v9 = vsel %vm208_vm1, %v557_v8, 0  ;;  %s572_s5 = scalar_lea.vmem %s571_s4, 256  ;;  %p573_p0 = scmp.lt.s32.totalorder %s725_s20, %s571_s4 }
  0x1c   : > { %500 = vmatpush3.bf16.xpose.msra.mxu1 %v269_v4  ;;  %p574_p1 = scmp.lt.s32.totalorder %s572_s5, %s566_s30 }
  0x1d   : > { %501 = vmatprep.subr.bf16.mxu1 %v630_v0 }
  0x1e   : > { %p575_p2 = por %p574_p1, %p573_p0 }
  0x20   : > { %p576_p3 = pnand %p575_p2, %p569_p13 }
  0x22   : > { %496 = vmatmul.mubr.msk.bf16.vlgmr.msra.gmra.mrb[0].mxu0 %vm208_vm1, %v201_v6 }
  0x24   : > { %502 = vmatpush3.bf16.xpose.msra.mxu1 %v272_v7 }
  0x25   : > { %503 = vmatprep.subr.bf16.mxu1 %v630_v0 }
  0x2c   : > { %504 = vmatpush3.bf16.xpose.msra.mxu1 %v275_v9 }
  0x33   : > { %506 = vmatmul.mubr.msk.bf16.vlgmr.msra.gmra.mrb[0].mxu1 %vm208_vm1, %v201_v6 }
  0xf5   : > { %v249_v10 = vpop.f32.mrb[0].mxu0 }
  0xf6   : > { %v319_v11 = vand.u32 2147483647, %v249_v10  ;;  %v497_v12 = vpop.f32.mrb[1].mxu0  ;;  %v317_v30 = vsub.f32 0.0, %v249_v10 }
  0xf7   : > { %v252_v13 = vpop.f32.mrb[2].mxu0 }
  0xf8   : > { %v320_v14 = vsub.f32 0.0, %v319_v11  ;;  %v498_v15 = vpop.f32.mrb[3].mxu0  ;;  %v318_v34 = vmax.f32 %v317_v30, 0.0 }
  0xfa   : > { %v321_v16 = vmul.f32 1.442695, %v320_v14 }
  0xfc   : > { %558 = vpow2.f32 %v321_v16 }
 0x106   : > { %v559_v17 = vpop.eup %558  ;;  %v311_v18 = vpop.f32.mrb[0].mxu1 }
 0x107   : > { %v323_v19 = vadd.f32 1.0, %v559_v17  ;;  %v333_v20 = vsub.f32 0.0, %v311_v18  ;;  %v507_v21 = vpop.f32.mrb[1].mxu1  ;;  %v326_v25 = vmul.f32 -0.5, %v559_v17  ;;  %v329_v29 = vand.u32 2147483647, %v559_v17 }
 0x108   : > { %v314_v22 = vpop.f32.mrb[2].mxu1 }
 0x109   : > { %560 = vlog2.f32 %v323_v19  ;;  %v336_v23 = vand.u32 2147483647, %v333_v20  ;;  %v508_v24 = vpop.f32.mrb[3].mxu1  ;;  %v327_v28 = vadd.f32 1.0, %v326_v25  ;;  %vm330_vm2 = vcmp.lt.f32.partialorder %v329_v29, 0.0004427343 }
 0x10a   : > { %v334_v42 = vsub.f32 0.0, %v333_v20 }
 0x10b   : > { %v337_v26 = vsub.f32 0.0, %v336_v23  ;;  %v328_v31 = vmul.f32 %v559_v17, %v327_v28 }
 0x10c   : > { %v335_v47 = vmax.f32 %v334_v42, 0.0 }
 0x10d   : > { %v338_v27 = vmul.f32 1.442695, %v337_v26 }
 0x10f   : > { %562 = vpow2.f32 %v338_v27 }
 0x113   : > { %v561_v32 = vpop.eup %560 }
 0x114   : > { %v325_v33 = vmul.f32 0.6931472, %v561_v32 }
 0x116   : > { %v331_v35 = vsel %vm330_vm2, %v328_v31, %v325_v33 }
 0x117   : > { %v332_v36 = vadd.f32 %v331_v35, %v318_v34 }
 0x119   : > { %v353_v37 = vsel %vm352_vm3, %v332_v36, 0.0  ;;  %v563_v38 = vpop.eup %562 }
 0x11a   : > { %354 = vadd.xlane.f32.xlu0 %v353_v37  ;;  %v340_v39 = vadd.f32 1.0, %v563_v38  ;;  %v343_v40 = vmul.f32 -0.5, %v563_v38  ;;  %v346_v43 = vand.u32 2147483647, %v563_v38 }
 0x11c   : > { %564 = vlog2.f32 %v340_v39  ;;  %v344_v41 = vadd.f32 1.0, %v343_v40  ;;  %vm347_vm4 = vcmp.lt.f32.partialorder %v346_v43, 0.0004427343 }
 0x11e   : > { %v345_v46 = vmul.f32 %v563_v38, %v344_v41 }
 0x126   : > { %v565_v44 = vpop.eup %564 }
 0x127   : > { %v342_v45 = vmul.f32 0.6931472, %v565_v44 }
 0x129   : > { %v348_v48 = vsel %vm347_vm4, %v345_v46, %v342_v45 }
 0x12a   : > { %v349_v49 = vadd.f32 %v348_v48, %v335_v47 }
 0x12c   : > { %v364_v50 = vsel %vm363_vm5, %v349_v49, 0.0 }
 0x12d   : > { %365 = vadd.xlane.f32.xlu0 %v364_v50 }
 0x1a7   : > { %v355_v51 = vpop.xlane.xlu0 %354 }
 0x1a8   : > { %v356_v52 = vrot.slane %v355_v51, 4 }
 0x1aa   : > { %v357_v53 = vadd.f32 %v356_v52, %v355_v51 }
 0x1ac   : > { %v358_v54 = vrot.slane %v357_v53, 2 }
 0x1ae   : > { %v359_v55 = vadd.f32 %v358_v54, %v357_v53 }
 0x1b0   : > { %v360_v56 = vrot.slane %v359_v55, 1 }
 0x1b2   : > { %v361_v57 = vadd.f32 %v360_v56, %v359_v55 }
 0x1b4   : > { %510 = vpush %v361_v57 }
 0x1ba   : > { %v366_v58 = vpop.xlane.xlu0 %365 }
 0x1bb   : > { %v367_v59 = vrot.slane %v366_v58, 4 }
 0x1bd   : > { %v368_v60 = vadd.f32 %v367_v59, %v366_v58 }
 0x1bf   : > { %v369_v61 = vrot.slane %v368_v60, 2 }
 0x1c1   : > { %v370_v62 = vadd.f32 %v369_v61, %v368_v60 }
 0x1c3   : > { %v371_v63 = vrot.slane %v370_v62, 1 }
 0x1c5   : > { %v372_v0 = vadd.f32 %v371_v63, %v370_v62 }
 0x1c7   : > { %512 = vpush %v372_v0 }
 0x1e5   : > { %s511_s17 = spop %510 }
 0x1f8   : > { %s513_s24 = spop %512 }
 0x1f9   : > { %s374_s25 = sadd.f32 %s513_s24, %s511_s17 }
 0x1fb   : > { %v375_v1 = vstv %s374_s25 }
 0x1fc   : > { %376 = vst [vmem:[%s187_s19] sm:$0xff] %v375_v1 }
 0x1fd   : > { %579 = shalt.err (!%p576_p3)
}
 0x1fe   : > { %s580_s6 = scalar_lea.hbm %s723_s28, 128  ;;  %s584_s9 = scalar_lea.hbm %s768_s3, 256 }
 0x1ff   : > { %p581_p4 = scmp.ne.s32.totalorder %s723_s28, %s580_s6  ;;  %p585_p9 = scmp.lt.u32.totalorder %s723_s28, %s768_s3 }
 0x200   : > { %p586_p10 = scmp.lt.u32.totalorder %s584_s9, %s580_s6  ;;  %p588_p12 = scmp.lt.u32.totalorder %s580_s6, %s723_s28 }
 0x201   : > { %p582_p7 = pnand %p581_p4, %p691_p5 }
 0x202   : > { %p587_p11 = por %p586_p10, %p585_p9 }
 0x203   : > { %p583_p8 = pneg %p582_p7 }
 0x204   : > { %p589_p13 = por %p588_p12, %p587_p11 }
 0x206   : > { %p590_p0 = pnand %p589_p13, %p583_p8 }
 0x208   : > { %593 = shalt.err (!%p590_p0)
}
 0x209   : > { %514 = dma.vmem_to_hbm [thread:$0]  (%p691_p5), %s725_s20, 128, %s723_s28, %s378_s29  }
 0x20a PF: > { %p520_p1 = scmp.ge.s32.totalorder %s628_s15, 2  ;;  %s403_s17 = sand.u32 1, %s616_s12  }
 0x20b   : > { %s404_s19 = scalar_lea.sflag [#allocation3], %s403_s17 }
 0x20c   : > { %p517_p2 = pnand %p520_p1, %p695_p6 }
 0x20e   : > { %611 = dma.done.wait (!%p517_p2), %s404_s19, 128  }
 0x20f   : > { %613 = vsyncadd (!%p517_p2), %s404_s19, 4294967168  ;;  %p13_p3 = scmp.ge.s32.totalorder %s678_s18, 4   ;;  %s771_s12 = smov %s620_s13 }
 0x210   : > { %s772_s13 = smov %s624_s14  ;;  %s773_s14 = smov %s689_s21 }
 0x211   : > { %s774_s15 = smov %s678_s18  ;;  %15 = sbr.rel (!%p13_p3) target bundleno = 3 (0x3), region = 73 }
 0x218   :  { %409 = vsyncpa [#allocation3], 1 }
 0x219   :  { %411 = vsyncpa [#allocation3 + $0x1], 1 }

</bundles_post_ra>
